<compile_context>
chip_gen: v7x
topology: tpu7x:2x2x1
jax: 0.10.0
libtpu: 0.0.40
codegen_flags: <defaults>
</compile_context>

<pallas_src>
import jax
import jax.numpy as jnp
from jax.experimental import pallas as pl
from jax.experimental.pallas import tpu as pltpu


# ---------------------------------------------------------------------------
# Kernel
# ---------------------------------------------------------------------------
def _fusion_kernel(w_ref, b_ref, x0_ref, x1_ref, o_ref):
    # w_ref: SMEM (2,) f32 conv weights, b_ref: SMEM (1,) f32 conv bias
    # x0_ref, x1_ref, o_ref: VMEM (block_b, 1, H, W) tiles (full spatial extent)
    w0 = w_ref[0]
    w1 = w_ref[1]
    bias = b_ref[0]
    acc = (x0_ref[...].astype(jnp.float32) * w0
           + x1_ref[...].astype(jnp.float32) * w1
           + bias)
    o_ref[...] = acc.astype(o_ref.dtype)


# ---------------------------------------------------------------------------
# Wrapper
# ---------------------------------------------------------------------------
def _vmem_capacity_bytes():
    try:
        return int(pltpu.get_tpu_info().vmem_capacity_bytes)
    except Exception:
        # Conservative fallback (v7x per-core VMEM).
        return 64 * 1024 * 1024


def fusion_layer(x_list, weight, bias):
    """Forward pass of _FusionLayer.

    Args:
      x_list: list of two arrays, each shaped (B, 1, H, W)  (NCHW, like PyTorch).
      weight: conv weight shaped (1, 2, 1, 1)  (out_ch, in_ch, kH, kW).
      bias:   conv bias shaped (1,).

    Returns:
      (B, 1, H, W) array, dtype = promotion of the two inputs' dtypes.
    """
    x0, x1 = x_list
    assert x0.shape == x1.shape, "both prediction surfaces must share a shape"
    B, C, H, W = x0.shape
    assert C == 1, "fusion layer expects single-channel surfaces"

    out_dtype = jnp.result_type(x0.dtype, x1.dtype)

    # ---- tile sizing: bytes-driven, VMEM-aware -------------------------------
    vmem_cap = _vmem_capacity_bytes()
    if vmem_cap >= 96 * 1024 * 1024:          # v5e / v6e (128 MiB physical)
        vmem_limit = 64 * 1024 * 1024
    else:                                     # v7x (64 MiB physical) / fallback
        vmem_limit = 32 * 1024 * 1024
    # 3 tensors x double-buffering = 6 resident tiles; leave ~25% headroom.
    target_tile_bytes = vmem_limit // 8

    slice_bytes = H * W * jnp.dtype(out_dtype).itemsize   # one (1, H, W) slice
    block_b = max(1, min(B, target_tile_bytes // max(1, slice_bytes)))
    grid_steps = pl.cdiv(B, block_b)

    # ---- scalars into SMEM via scalar prefetch -------------------------------
    w = weight.reshape(2).astype(jnp.float32)   # [w0, w1]
    b = bias.reshape(1).astype(jnp.float32)

    n = B * H * W
    bytes_accessed = (x0.size * jnp.dtype(x0.dtype).itemsize
                      + x1.size * jnp.dtype(x1.dtype).itemsize
                      + n * jnp.dtype(out_dtype).itemsize)
    cost = pl.CostEstimate(
        flops=4 * n,            # 2 mul + 2 add per output element
        transcendentals=0,
        bytes_accessed=bytes_accessed,
    )

    block = (block_b, 1, H, W)                       # trailing dims = full extent
    idx = lambda i, w_s, b_s: (i, 0, 0, 0)           # tile only over batch

    out = pl.pallas_call(
        _fusion_kernel,
        out_shape=jax.ShapeDtypeStruct((B, 1, H, W), out_dtype),
        grid_spec=pltpu.PrefetchScalarGridSpec(
            num_scalar_prefetch=2,                   # w and b land in SMEM
            grid=(grid_steps,),
            in_specs=[
                pl.BlockSpec(block, idx),
                pl.BlockSpec(block, idx),
            ],
            out_specs=pl.BlockSpec(block, idx),
        ),
        compiler_params=pltpu.CompilerParams(
            dimension_semantics=("parallel",),
            vmem_limit_bytes=vmem_limit,
        ),
        cost_estimate=cost,
    )(w, b, x0, x1)

    return out


# ---------------------------------------------------------------------------
# Self-test
# ---------------------------------------------------------------------------
if __name__ == "__main__":
    key = jax.random.PRNGKey(0)
    k0, k1, kw, kb = jax.random.split(key, 4)

    B, H, W = 2, 16, 16
    x0 = jax.random.normal(k0, (B, 1, H, W), dtype=jnp.float32)
    x1 = jax.random.normal(k1, (B, 1, H, W), dtype=jnp.float32)

    # Deterministic synthetic parameters (matching nn.Conv2d(2, 1, 1) shapes).
    weight = jax.random.normal(kw, (1, 2, 1, 1), dtype=jnp.float32) * 0.5
    bias = jax.random.normal(kb, (1,), dtype=jnp.float32) * 0.1

    ref = x0 * weight[0, 0, 0, 0] + x1 * weight[0, 1, 0, 0] + bias[0]

    # f32 path
    out = fusion_layer([x0, x1], weight, bias)
    out = jax.block_until_ready(out)
    assert out.shape == (B, 1, H, W)
    assert out.dtype == jnp.float32
    assert jnp.allclose(out, ref, atol=1e-6, rtol=1e-6)

    # bf16 path (exercises the explicit output cast + dtype promotion)
    out_bf16 = fusion_layer(
        [x0.astype(jnp.bfloat16), x1.astype(jnp.bfloat16)], weight, bias
    )
    out_bf16 = jax.block_until_ready(out_bf16)
    assert out_bf16.dtype == jnp.bfloat16
    assert jnp.allclose(out_bf16.astype(jnp.float32), ref, atol=3e-2, rtol=3e-2)

    print("KERNEL_OK")
</pallas_src>

<mosaic_0001>
module attributes {stable_mosaic.version = 11 : i64} {
  func.func @_fusion_kernel(%arg0: i32, %arg1: memref<2xf32, #tpu.memory_space<smem>>, %arg2: memref<1xf32, #tpu.memory_space<smem>>, %arg3: memref<2x1x16x16xf32, #tpu.memory_space<vmem>>, %arg4: memref<2x1x16x16xf32, #tpu.memory_space<vmem>>, %arg5: memref<2x1x16x16xf32, #tpu.memory_space<vmem>>) attributes {dimension_semantics = [#tpu.dimension_semantics<parallel>], iteration_bounds = array<i64: 1>, scalar_prefetch = 2 : i64, scratch_operands = 0 : i64, tpu.core_type = #tpu.core_type<tc>, window_params = [{transform_indices = @transform_0, window_bounds = array<i64: 2, 1, 16, 16>}, {transform_indices = @transform_1, window_bounds = array<i64: 2, 1, 16, 16>}, {transform_indices = @transform_2, window_bounds = array<i64: 2, 1, 16, 16>}]} {
    %c0 = arith.constant 0 : index
    %0 = memref.load %arg1[%c0] : memref<2xf32, #tpu.memory_space<smem>>
    %c1 = arith.constant 1 : index
    %1 = memref.load %arg1[%c1] : memref<2xf32, #tpu.memory_space<smem>>
    %c0_0 = arith.constant 0 : index
    %2 = memref.load %arg2[%c0_0] : memref<1xf32, #tpu.memory_space<smem>>
    %c0_1 = arith.constant 0 : index
    %c0_2 = arith.constant 0 : index
    %c0_3 = arith.constant 0 : index
    %c0_4 = arith.constant 0 : index
    %3 = vector.load %arg3[%c0_1, %c0_2, %c0_3, %c0_4] : memref<2x1x16x16xf32, #tpu.memory_space<vmem>>, vector<2x1x16x16xf32>
    %4 = vector.broadcast %0 : f32 to vector<2x1x16x16xf32>
    %5 = arith.mulf %3, %4 : vector<2x1x16x16xf32>
    %c0_5 = arith.constant 0 : index
    %c0_6 = arith.constant 0 : index
    %c0_7 = arith.constant 0 : index
    %c0_8 = arith.constant 0 : index
    %6 = vector.load %arg4[%c0_5, %c0_6, %c0_7, %c0_8] : memref<2x1x16x16xf32, #tpu.memory_space<vmem>>, vector<2x1x16x16xf32>
    %7 = vector.broadcast %1 : f32 to vector<2x1x16x16xf32>
    %8 = arith.mulf %6, %7 : vector<2x1x16x16xf32>
    %9 = arith.addf %5, %8 : vector<2x1x16x16xf32>
    %10 = vector.broadcast %2 : f32 to vector<2x1x16x16xf32>
    %11 = arith.addf %9, %10 : vector<2x1x16x16xf32>
    %c0_9 = arith.constant 0 : index
    %c0_10 = arith.constant 0 : index
    %c0_11 = arith.constant 0 : index
    %c0_12 = arith.constant 0 : index
    %12 = vector.load %arg5[%c0_9, %c0_10, %c0_11, %c0_12] : memref<2x1x16x16xf32, #tpu.memory_space<vmem>>, vector<2x1x16x16xf32>
    tpu.vector_store %arg5[%c0_9, %c0_10, %c0_11, %c0_12], %11 {strides = array<i32>} : memref<2x1x16x16xf32, #tpu.memory_space<vmem>>, vector<2x1x16x16xf32>,
    return
  }
  func.func @transform_0(%arg0: i32, %arg1: memref<2xf32, #tpu.memory_space<smem>>, %arg2: memref<1xf32, #tpu.memory_space<smem>>) -> (i32, i32, i32, i32) {
    %c0_i32 = arith.constant 0 : i32
    %c0_i32_0 = arith.constant 0 : i32
    %c0_i32_1 = arith.constant 0 : i32
    %c0_i32_2 = arith.constant 0 : i32
    return %arg0, %c0_i32, %c0_i32_0, %c0_i32_1 : i32, i32, i32, i32
  }
  func.func @transform_1(%arg0: i32, %arg1: memref<2xf32, #tpu.memory_space<smem>>, %arg2: memref<1xf32, #tpu.memory_space<smem>>) -> (i32, i32, i32, i32) {
    %c0_i32 = arith.constant 0 : i32
    %c0_i32_0 = arith.constant 0 : i32
    %c0_i32_1 = arith.constant 0 : i32
    %c0_i32_2 = arith.constant 0 : i32
    return %arg0, %c0_i32, %c0_i32_0, %c0_i32_1 : i32, i32, i32, i32
  }
  func.func @transform_2(%arg0: i32, %arg1: memref<2xf32, #tpu.memory_space<smem>>, %arg2: memref<1xf32, #tpu.memory_space<smem>>) -> (i32, i32, i32, i32) {
    %c0_i32 = arith.constant 0 : i32
    %c0_i32_0 = arith.constant 0 : i32
    %c0_i32_1 = arith.constant 0 : i32
    %c0_i32_2 = arith.constant 0 : i32
    return %arg0, %c0_i32, %c0_i32_0, %c0_i32_1 : i32, i32, i32, i32
  }
}

</mosaic_0001>

<bundles_post_ra>
// kernel: tpu_custom_call.1
= control target key start
LH: loop header
LB: loop body
LE: loop exit
PB: predicated region body
PF: predicated region fallthrough
CT: control target
= control target key end

     0   :  { %s277_s0 = inlined_call_operand.vmem [shape: f32[2], index: 0, kind: input, shape index: {}]   ;;  %s278_s1 = inlined_call_operand.<no memory space> [shape: f32[1], index: 1, kind: input, shape index: {}]   ;;  %s279_s2 = inlined_call_operand.hbm [shape: f32[2,1,16,16], index: 2, kind: input, shape index: {}]   ;;  %s280_s3 = inlined_call_operand.hbm [shape: f32[2,1,16,16], index: 3, kind: input, shape index: {}]   ;;  %s281_s4 = inlined_call_operand.hbm [shape: f32[2,1,16,16], index: 4, kind: output, shape index: {}]  }
   0x1   :  { %s9_s17 = sshll.u32 %s277_s0, 4  ;;  %s10_s17 = int_to_ptr.vmem [resolvable:$true] %s9_s17 }
   0x2   :  { %s109_s18 = scalar_lea.vmem %s10_s17, 16  ;;  %p114_p1 = scmp.lt.s32.totalorder %s10_s17, %s10_s17 }
   0x3   :  { %p110_p0 = scmp.ne.s32.totalorder %s10_s17, %s109_s18  ;;  %p115_p2 = scmp.lt.s32.totalorder %s109_s18, %s109_s18 }
   0x5   :  { %p116_p3 = por %p115_p2, %p114_p1 }
   0x7   :  { %p117_p4 = pnand %p116_p3, %p110_p0 }
   0x9   :  { %120 = shalt.err (!%p117_p4)  }
   0xa   :  { %s195_s19 = smov [#allocation3]  }
   0xb   :  { %12 = dma.vmem_to_smem %s10_s17, 16, %s195_s19, [#allocation2] }
   0xc   :  { %187 = dma.done.wait [#allocation2], 16 }
   0xd   :  { %188 = vsyncadd [#allocation2], 4294967280 }
   0xe   :  { %15 = sfence }
   0xf   :  { %16 = vsyncpa [#allocation6], 0 }
  0x10   :  { %17 = vsyncpa [#allocation9], 0 }
  0x11   :  { %18 = vsyncpa [#allocation7], 0  ;;  %s196_s20 = smov [#allocation5]   ;;  %s121_s23 = scalar_lea.hbm %s279_s2, 512 }
  0x12   :  { %s24_s21 = sshll.u32 %s196_s20, 4  ;;  %p122_p5 = scmp.ne.s32.totalorder %s279_s2, %s121_s23  ;;  %s25_s21 = int_to_ptr.vmem [resolvable:$true] %s24_s21 }
  0x13   :  { %p125_p6 = scmp.lt.u32.totalorder %s121_s23, %s279_s2 }
  0x15   :  { %p127_p7 = pnand %p125_p6, %p122_p5 }
  0x17   :  { %130 = shalt.err (!%p127_p7)
}
  0x18   :  { %s131_s28 = scalar_lea.vmem %s25_s21, 512  ;;  %p136_p9 = scmp.lt.s32.totalorder %s25_s21, %s25_s21 }
  0x19   :  { %p132_p8 = scmp.ne.s32.totalorder %s25_s21, %s131_s28  ;;  %p137_p10 = scmp.lt.s32.totalorder %s131_s28, %s131_s28 }
  0x1b   :  { %p138_p11 = por %p137_p10, %p136_p9 }
  0x1d   :  { %p139_p12 = pnand %p138_p11, %p132_p8 }
  0x1f   :  { %142 = shalt.err (!%p139_p12)
}
  0x20   :  { %s197_s29 = smov 128   ;;  %s198_s30 = smov 8  }
  0x21   :  { %30 = dma.hbm_to_vmem [thread:$0]  %s279_s2, 512, %s25_s21, [#allocation6], %s197_s29, %s197_s29, %s198_s30  }
  0x22   :  { %s199_s7 = smov [#allocation8]   ;;  %s143_s11 = scalar_lea.hbm %s280_s3, 512 }
  0x23   :  { %s36_s8 = sshll.u32 %s199_s7, 4  ;;  %p144_p13 = scmp.ne.s32.totalorder %s280_s3, %s143_s11  ;;  %s37_s8 = int_to_ptr.vmem [resolvable:$true] %s36_s8 }
  0x24   :  { %p147_p0 = scmp.lt.u32.totalorder %s143_s11, %s280_s3 }
  0x26   :  { %p149_p1 = pnand %p147_p0, %p144_p13 }
  0x28   :  { %152 = shalt.err (!%p149_p1)
}
  0x29   :  { %s153_s16 = scalar_lea.vmem %s37_s8, 512  ;;  %p158_p3 = scmp.lt.s32.totalorder %s37_s8, %s37_s8 }
  0x2a   :  { %p154_p2 = scmp.ne.s32.totalorder %s37_s8, %s153_s16  ;;  %p159_p4 = scmp.lt.s32.totalorder %s153_s16, %s153_s16 }
  0x2c   :  { %p160_p5 = por %p159_p4, %p158_p3 }
  0x2e   :  { %p161_p6 = pnand %p160_p5, %p154_p2 }
  0x30   :  { %164 = shalt.err (!%p161_p6)
}
  0x31   :  { %42 = dma.hbm_to_vmem [thread:$0]  %s280_s3, 512, %s37_s8, [#allocation9], %s197_s29, %s197_s29, %s198_s30  }
  0x32   :  { %189 = dma.done.wait [#allocation6], 512  }
  0x33   :  { %190 = vsyncadd [#allocation6], 4294966784 }
  0x34   :  { %191 = dma.done.wait [#allocation9], 512  }
  0x35   :  { %192 = vsyncadd [#allocation9], 4294966784  ;;  %s49_s18 = sld [smem:[#allocation3]]  ;;  %s102_s19 = sld [smem:[#allocation3 + $0x1]]  ;;  %v52_v0 = vld [vmem:[#allocation5] sm:$0xff]  ;;  %v53_v4 = vld [vmem:[#allocation5 + $0x8] sm:$0xff]  ;;  %v74_v11 = vstv %s278_s1 }
  0x36   :  { %v61_v2 = vld [vmem:[#allocation8] sm:$0xff]  ;;  %v62_v8 = vld [vmem:[#allocation8 + $0x8] sm:$0xff]  ;;  %v54_v9 = vld [vmem:[#allocation5 + $0x10] sm:$0xff]  ;;  %vm79_vm0 = vcmask 130048   ;;  %s200_s3 = smov [#allocation10]  }
  0x37   :  { %v63_v10 = vld [vmem:[#allocation8 + $0x10] sm:$0xff]  ;;  %v55_v15 = vld [vmem:[#allocation5 + $0x18] sm:$0xff]  ;;  %s89_s0 = sshll.u32 %s200_s3, 4  ;;  %s90_s0 = int_to_ptr.vmem [resolvable:$true] %s89_s0 }
  0x38   :  { %v64_v16 = vld [vmem:[#allocation8 + $0x18] sm:$0xff]  ;;  %s165_s1 = scalar_lea.vmem %s90_s0, 512  ;;  %p170_p8 = scmp.lt.s32.totalorder %s90_s0, %s90_s0 }
  0x39   :  { %p166_p7 = scmp.ne.s32.totalorder %s90_s0, %s165_s1  ;;  %p171_p9 = scmp.lt.s32.totalorder %s165_s1, %s165_s1 }
  0x3b   :  { %v56_v1 = vstv %s49_s18  ;;  %v65_v3 = vstv %s102_s19  ;;  %p172_p10 = por %p171_p9, %p170_p8 }
  0x3c   :  { %v57_v5 = vmul.f32 %v56_v1, %v52_v0  ;;  %v66_v6 = vmul.f32 %v65_v3, %v61_v2  ;;  %v58_v7 = vmul.f32 %v56_v1, %v53_v4  ;;  %v67_v12 = vmul.f32 %v65_v3, %v62_v8 }
  0x3d   :  { %v59_v13 = vmul.f32 %v56_v1, %v54_v9  ;;  %v68_v14 = vmul.f32 %v65_v3, %v63_v10  ;;  %v60_v18 = vmul.f32 %v56_v1, %v55_v15  ;;  %v69_v19 = vmul.f32 %v65_v3, %v64_v16  ;;  %p173_p11 = pnand %p172_p10, %p166_p7 }
  0x3e   :  { %v70_v17 = vadd.f32 %v66_v6, %v57_v5  ;;  %v71_v20 = vadd.f32 %v67_v12, %v58_v7 }
  0x3f   :  { %v72_v21 = vadd.f32 %v68_v14, %v59_v13  ;;  %v73_v23 = vadd.f32 %v69_v19, %v60_v18 }
  0x40   :  { %v75_v22 = vadd.f32 %v74_v11, %v70_v17  ;;  %v76_v24 = vadd.f32 %v74_v11, %v71_v20 }
  0x41   :  { %v77_v25 = vadd.f32 %v74_v11, %v72_v21  ;;  %v78_v26 = vadd.f32 %v74_v11, %v73_v23 }
  0x42   :  { %80 = vst.msk [vmem:[#allocation10] sm:$0xff] %vm79_vm0, %v75_v22  ;;  %81 = vst.msk [vmem:[#allocation10 + $0x8] sm:$0xff] %vm79_vm0, %v76_v24 }
  0x43   :  { %82 = vst.msk [vmem:[#allocation10 + $0x10] sm:$0xff] %vm79_vm0, %v77_v25  ;;  %83 = vst.msk [vmem:[#allocation10 + $0x18] sm:$0xff] %vm79_vm0, %v78_v26 }
  0x44   :  { %176 = shalt.err (!%p173_p11)
}
  0x45   :  { %s177_s24 = scalar_lea.hbm %s281_s4, 512 }
  0x46   :  { %p178_p12 = scmp.ne.s32.totalorder %s281_s4, %s177_s24  ;;  %p181_p13 = scmp.lt.u32.totalorder %s177_s24, %s281_s4 }
  0x48   :  { %p183_p0 = pnand %p181_p13, %p178_p12 }
  0x4a   :  { %186 = shalt.err (!%p183_p0)
}
  0x4b   :  { %95 = dma.vmem_to_hbm [thread:$0]  %s90_s0, 512, %s281_s4, [#allocation7], %s197_s29, %s197_s29, %s198_s30  }
  0x4c   :  { %193 = dma.done.wait [#allocation7], 512  }
  0x4d   :  { %194 = vsyncadd [#allocation7], 4294966784 }
  0x4e   :  { %99 = vsyncpa [#allocation6], 1 }
  0x4f   :  { %100 = vsyncpa [#allocation9], 1 }
  0x50   :  { %101 = vsyncpa [#allocation7], 1 }

</bundles_post_ra>
